<compile_context>
chip_gen: v7x
topology: tpu7x:2x2x1
jax: 0.10.0
libtpu: 0.0.40
codegen_flags: <defaults>
</compile_context>

<pallas_src>
import functools
import math

import jax
import jax.numpy as jnp
from jax import lax
from jax.experimental import pallas as pl
from jax.experimental.pallas import tpu as pltpu

DIM = 100        # logical feature dim (Linear(100, 100))
DIM_PAD = 128    # lane-aligned padded feature dim
_SUBLANE = 8

_VMEM_SPEC = pl.BlockSpec(memory_space=pltpu.MemorySpace.VMEM)
_SMEM_SPEC = pl.BlockSpec(memory_space=pltpu.MemorySpace.SMEM)


def _round_up(n, m):
    return ((n + m - 1) // m) * m


# ---------------------------------------------------------------------------
# Kernels
# ---------------------------------------------------------------------------
def _odefunc_kernel(x_ref, w_ref, b_ref, o_ref):
    # x_ref: (Bp, 128), w_ref: (128, 128) holding W.T (padded), b_ref: (1, 128)
    y = jnp.dot(x_ref[...], w_ref[...], preferred_element_type=jnp.float32)
    o_ref[...] = jnp.tanh(y + b_ref[...]).astype(o_ref.dtype)


def _make_euler_kernel(n_steps):
    """Fused integrator: n_steps explicit-Euler steps of dx/dt = tanh(x W_t + b).

    W/b are DMA'd into VMEM once and stay resident for every evaluation.
    dt comes in as a runtime SMEM scalar (no recompilation per dt).
    Zero feature padding is preserved: padded lanes stay exactly 0.
    """

    def kernel(x_ref, w_ref, b_ref, dt_ref, o_ref):
        w = w_ref[...]
        b = b_ref[...]
        dt = dt_ref[0, 0]

        def body(_, x):
            f = jnp.tanh(jnp.dot(x, w, preferred_element_type=jnp.float32) + b)
            return x + dt * f

        x0 = x_ref[...].astype(jnp.float32)
        xN = lax.fori_loop(0, n_steps, body, x0, unroll=min(8, n_steps))
        o_ref[...] = xN.astype(o_ref.dtype)

    return kernel


# ---------------------------------------------------------------------------
# Parameter / state prep (done ONCE, outside the hot path)
# ---------------------------------------------------------------------------
def prepare_params(w, b):
    """Pad + pre-transpose PyTorch-layout params.

    w: (out=100, in=100) -> w_pad: (128, 128) with W.T in [:100, :100]
    b: (100,)            -> b_pad: (1, 128)
    """
    w = jnp.asarray(w, jnp.float32)
    b = jnp.asarray(b, jnp.float32)
    w_pad = jnp.zeros((DIM_PAD, DIM_PAD), jnp.float32).at[:DIM, :DIM].set(w.T)
    b_pad = jnp.zeros((1, DIM_PAD), jnp.float32).at[:, :DIM].set(b)
    return w_pad, b_pad


def pad_state(x):
    """(B, 100) -> (Bp, 128) zero-padded state.  Do this ONCE per solve."""
    B, D = x.shape
    Bp = _round_up(B, _SUBLANE)
    return jnp.zeros((Bp, DIM_PAD), jnp.float32).at[:B, :D].set(x)


def unpad_state(x_pad, batch, dim=DIM):
    """(Bp, 128) -> (B, dim).  Do this ONCE at the end of a solve."""
    return x_pad[:batch, :dim]


# ---------------------------------------------------------------------------
# Padded-state entry points (hot path: no pad/slice per call)
# ---------------------------------------------------------------------------
@jax.jit
def odefunc_forward_padded(x_pad, w_pad, b_pad):
    """One f-evaluation on padded (Bp, 128) state; returns padded state."""
    Bp = x_pad.shape[0]
    ce = pl.CostEstimate(
        flops=2 * Bp * DIM_PAD * DIM_PAD,
        transcendentals=Bp * DIM_PAD,
        bytes_accessed=(2 * Bp * DIM_PAD + DIM_PAD * DIM_PAD + DIM_PAD) * 4,
    )
    return pl.pallas_call(
        _odefunc_kernel,
        out_shape=jax.ShapeDtypeStruct((Bp, DIM_PAD), x_pad.dtype),
        in_specs=[_VMEM_SPEC, _VMEM_SPEC, _VMEM_SPEC],
        out_specs=_VMEM_SPEC,
        cost_estimate=ce,
    )(x_pad, w_pad, b_pad)


@functools.partial(jax.jit, static_argnames=("n_steps",))
def odefunc_euler_integrate_padded(x_pad, w_pad, b_pad, dt, *, n_steps=8):
    """n_steps Euler steps of dx/dt = ODEFunc(t, x) in ONE pallas_call.

    State stays padded (Bp, 128); dt is a runtime scalar (SMEM) so changing dt
    does NOT trigger recompilation.  Input state is aliased to the output.
    """
    Bp = x_pad.shape[0]
    dt_arr = jnp.asarray(dt, jnp.float32).reshape(1, 1)
    ce = pl.CostEstimate(
        flops=(2 * Bp * DIM_PAD * DIM_PAD + 3 * Bp * DIM_PAD) * n_steps,
        transcendentals=Bp * DIM_PAD * n_steps,
        bytes_accessed=(2 * Bp * DIM_PAD + DIM_PAD * DIM_PAD + DIM_PAD) * 4 + 4,
    )
    return pl.pallas_call(
        _make_euler_kernel(n_steps),
        out_shape=jax.ShapeDtypeStruct((Bp, DIM_PAD), x_pad.dtype),
        in_specs=[_VMEM_SPEC, _VMEM_SPEC, _VMEM_SPEC, _SMEM_SPEC],
        out_specs=_VMEM_SPEC,
        input_output_aliases={0: 0},
        cost_estimate=ce,
    )(x_pad, w_pad, b_pad, dt_arr)


# ---------------------------------------------------------------------------
# Convenience wrappers mirroring the PyTorch module interface
# ---------------------------------------------------------------------------
@jax.jit
def odefunc_forward(t, x, w_pad, b_pad):
    """Pallas equivalent of ODEFunc.forward(t, x). `t` is ignored (as in PyTorch)."""
    del t
    B, D = x.shape
    out = odefunc_forward_padded(pad_state(x), w_pad, b_pad)
    return out[:B, :D]


@functools.partial(jax.jit, static_argnames=("n_steps",))
def odefunc_euler_integrate(x, w_pad, b_pad, dt, *, n_steps=8):
    """Pad once -> fused n_steps Euler solve -> slice once."""
    B, D = x.shape
    out = odefunc_euler_integrate_padded(pad_state(x), w_pad, b_pad, dt,
                                         n_steps=n_steps)
    return out[:B, :D]


# ---------------------------------------------------------------------------
# Init matching the PyTorch module
# ---------------------------------------------------------------------------
def init_params(key, dim=DIM):
    kw, kb = jax.random.split(key)
    # xavier_uniform_(weight, gain=sqrt(2)) for weight of shape (out, in)
    gain = math.sqrt(2.0)
    fan_in, fan_out = dim, dim
    limit = gain * math.sqrt(6.0 / (fan_in + fan_out))
    w = jax.random.uniform(kw, (dim, dim), jnp.float32, -limit, limit)
    # PyTorch default bias init: U(-1/sqrt(fan_in), 1/sqrt(fan_in))
    bound = 1.0 / math.sqrt(fan_in)
    b = jax.random.uniform(kb, (dim,), jnp.float32, -bound, bound)
    return w, b


if __name__ == "__main__":
    key = jax.random.PRNGKey(0)
    kx, kp = jax.random.split(key)

    batch = 8
    x = jax.random.normal(kx, (batch, DIM), jnp.float32)
    t = jnp.float32(0.0)                 # unused, mirrors the PyTorch signature
    w, b = init_params(kp, DIM)
    w_pad, b_pad = prepare_params(w, b)  # once, outside the hot loop

    # --- single forward: exactly the module's forward -----------------------
    out = jax.block_until_ready(odefunc_forward(t, x, w_pad, b_pad))
    ref = jnp.tanh(x @ w.T + b)
    assert out.shape == (batch, DIM)
    assert jnp.allclose(out, ref, atol=1e-5, rtol=1e-5)

    # --- fused multi-evaluation kernel; dt is runtime (no recompile per dt) --
    n_steps = 8
    for dt in (0.1, 0.05):
        fused = jax.block_until_ready(
            odefunc_euler_integrate(x, w_pad, b_pad, dt, n_steps=n_steps))
        ref_e = x
        for _ in range(n_steps):
            ref_e = ref_e + dt * jnp.tanh(ref_e @ w.T + b)
        assert fused.shape == (batch, DIM)
        assert jnp.allclose(fused, ref_e, atol=1e-4, rtol=1e-4)

    # --- padded-state path: pad once, solve in chunks, slice once -----------
    x_pad = pad_state(x)
    x_pad = odefunc_euler_integrate_padded(x_pad, w_pad, b_pad, 0.1, n_steps=4)
    x_pad = odefunc_euler_integrate_padded(x_pad, w_pad, b_pad, 0.05, n_steps=4)
    jax.block_until_ready(x_pad)
    ref_p = x
    for _ in range(4):
        ref_p = ref_p + 0.1 * jnp.tanh(ref_p @ w.T + b)
    for _ in range(4):
        ref_p = ref_p + 0.05 * jnp.tanh(ref_p @ w.T + b)
    assert jnp.allclose(unpad_state(x_pad, batch), ref_p, atol=1e-4, rtol=1e-4)

    print("KERNEL_OK")
</pallas_src>

<mosaic_0001>
module attributes {stable_mosaic.version = 11 : i64} {
  func.func @_odefunc_kernel(%arg0: memref<8x128xf32, #tpu.memory_space<vmem>>, %arg1: memref<128x128xf32, #tpu.memory_space<vmem>>, %arg2: memref<1x128xf32, #tpu.memory_space<vmem>>, %arg3: memref<8x128xf32, #tpu.memory_space<vmem>>) attributes {dimension_semantics = [], scalar_prefetch = 0 : i64, scratch_operands = 0 : i64, tpu.core_type = #tpu.core_type<tc>} {
    %c0 = arith.constant 0 : index
    %c0_0 = arith.constant 0 : index
    %0 = vector.load %arg0[%c0, %c0_0] : memref<8x128xf32, #tpu.memory_space<vmem>>, vector<8x128xf32>
    %c0_1 = arith.constant 0 : index
    %c0_2 = arith.constant 0 : index
    %1 = vector.load %arg1[%c0_1, %c0_2] : memref<128x128xf32, #tpu.memory_space<vmem>>, vector<128x128xf32>
    %cst = arith.constant dense<0.000000e+00> : vector<8x128xf32>
    %2 = tpu.matmul %0, %1, %cst {dimension_numbers = #tpu.dot_dimension_numbers<[1], [0], [0], [1], [0, 0, 1, 1], [], []>} : vector<8x128xf32>, vector<128x128xf32>, vector<8x128xf32> -> vector<8x128xf32>
    %c0_3 = arith.constant 0 : index
    %c0_4 = arith.constant 0 : index
    %3 = vector.load %arg2[%c0_3, %c0_4] : memref<1x128xf32, #tpu.memory_space<vmem>>, vector<1x128xf32>
    %4 = vector.broadcast %3 : vector<1x128xf32> to vector<8x128xf32>
    %5 = arith.addf %2, %4 : vector<8x128xf32>
    %6 = math.tanh %5 : vector<8x128xf32>
    %c0_5 = arith.constant 0 : index
    %c0_6 = arith.constant 0 : index
    %7 = vector.load %arg3[%c0_5, %c0_6] : memref<8x128xf32, #tpu.memory_space<vmem>>, vector<8x128xf32>
    tpu.vector_store %arg3[%c0_5, %c0_6], %6 {strides = array<i32>} : memref<8x128xf32, #tpu.memory_space<vmem>>, vector<8x128xf32>,
    return
  }
}

</mosaic_0001>

<bundles_post_ra>
// kernel: odefunc_forward_padded.1
= control target key start
LH: loop header
LB: loop body
LE: loop exit
PB: predicated region body
PF: predicated region fallthrough
CT: control target
= control target key end

     0   :  { %8 = vsyncpa [#allocation3], 0  ;;  %s386_s0 = inlined_call_operand.hbm [shape: f32[8,128], index: 0, kind: input, shape index: {}]   ;;  %s387_s1 = inlined_call_operand.hbm [shape: f32[128,128], index: 1, kind: input, shape index: {}]   ;;  %s388_s2 = inlined_call_operand.vmem [shape: f32[1,128], index: 2, kind: input, shape index: {}]   ;;  %s389_s3 = inlined_call_operand.hbm [shape: f32[8,128], index: 3, kind: output, shape index: {}]  }
   0x1   :  { %9 = vsyncpa [#allocation6], 0 }
   0x2   :  { %10 = vsyncpa [#allocation4], 0  ;;  %s312_s12 = smov [#allocation2]   ;;  %s313_s14 = smov [#allocation5]  }
   0x3   :  { %s17_s13 = sshll.u32 %s312_s12, 4  ;;  %s26_s15 = sshll.u32 %s313_s14, 4  ;;  %s18_s13 = int_to_ptr.vmem [resolvable:$true] %s17_s13  ;;  %s340_s15 = int_to_ptr.vmem [resolvable:$true] %s26_s15 }
   0x4   :  { %s240_s18 = scalar_lea.hbm %s386_s0, 128 }
   0x5   :  { %p241_p0 = scmp.ne.s32.totalorder %s386_s0, %s240_s18  ;;  %p244_p1 = scmp.lt.u32.totalorder %s240_s18, %s386_s0 }
   0x7   :  { %p246_p2 = pnand %p244_p1, %p241_p0 }
   0x9   :  { %249 = shalt.err (!%p246_p2)
}
   0xa   :  { %s250_s23 = scalar_lea.vmem %s18_s13, 128  ;;  %p255_p4 = scmp.lt.s32.totalorder %s18_s13, %s18_s13 }
   0xb   :  { %p251_p3 = scmp.ne.s32.totalorder %s18_s13, %s250_s23  ;;  %p256_p5 = scmp.lt.s32.totalorder %s250_s23, %s250_s23 }
   0xd   :  { %p257_p6 = por %p256_p5, %p255_p4 }
   0xf   :  { %p258_p7 = pnand %p257_p6, %p251_p3 }
  0x11   :  { %261 = shalt.err (!%p258_p7)
}
  0x12   :  { %20 = dma.hbm_to_vmem [thread:$0]  %s386_s0, 128, %s18_s13, [#allocation3]  }
  0x13   :  { %s262_s28 = scalar_lea.hbm %s387_s1, 2048 }
  0x14   :  { %p263_p8 = scmp.ne.s32.totalorder %s387_s1, %s262_s28  ;;  %p266_p9 = scmp.lt.u32.totalorder %s262_s28, %s387_s1 }
  0x16   :  { %p268_p10 = pnand %p266_p9, %p263_p8 }
  0x18   :  { %271 = shalt.err (!%p268_p10)
}
  0x19   :  { %s272_s6 = scalar_lea.vmem %s340_s15, 2048  ;;  %p277_p12 = scmp.lt.s32.totalorder %s340_s15, %s340_s15 }
  0x1a   :  { %p273_p11 = scmp.ne.s32.totalorder %s340_s15, %s272_s6  ;;  %p278_p13 = scmp.lt.s32.totalorder %s272_s6, %s272_s6 }
  0x1c   :  { %p279_p0 = por %p278_p13, %p277_p12 }
  0x1e   :  { %p280_p1 = pnand %p279_p0, %p273_p11 }
  0x20   :  { %283 = shalt.err (!%p280_p1)
}
  0x21   :  { %s314_s0 = smov 128   ;;  %s315_s7 = smov 8  }
  0x22   :  { %32 = dma.hbm_to_vmem [thread:$0]  %s387_s1, 2048, %s340_s15, [#allocation6], %s314_s0, %s314_s0, %s315_s7  }
  0x23   :  { %306 = dma.done.wait [#allocation3], 128  }
  0x24   :  { %307 = vsyncadd [#allocation3], 4294967168 }
  0x25   :  { %308 = dma.done.wait [#allocation6], 2048  }
  0x26   :  { %309 = vsyncadd [#allocation6], 4294965248  ;;  %v316_v0 = vmov 0.0|0.0   ;;  %vm317_vm0 = vmmov 0   ;;  %v318_v1 = vmov 0.0   ;;  %v42_v2 = vld [vmem:[#allocation5] sm:$0xff] }
  0x27   :  { %206 = vmatprep.subr.bf16.mxu0 %v316_v0  ;;  %203 = vmatprep.mubr.msk.f32.mxu0 %vm317_vm0, %v318_v1  ;;  %v43_v3 = vld [vmem:[#allocation5 + $0x8] sm:$0xff]  ;;  %v44_v4 = vld [vmem:[#allocation5 + $0x10] sm:$0xff]  ;;  %v45_v6 = vld [vmem:[#allocation5 + $0x18] sm:$0xff]  ;;  %s319_s11 = smov [#allocation7]  }
  0x28   :  { %v207_v5 = vpack.c.bf16 %v43_v3, %v42_v2  ;;  %v210_v7 = vpack.c.bf16 %v45_v6, %v44_v4  ;;  %v46_v8 = vld [vmem:[#allocation5 + $0x20] sm:$0xff]  ;;  %v47_v9 = vld [vmem:[#allocation5 + $0x28] sm:$0xff]  ;;  %v48_v11 = vld [vmem:[#allocation5 + $0x30] sm:$0xff]  ;;  %s143_s12 = sshll.u32 %s319_s11, 4  ;;  %s144_s12 = int_to_ptr.vmem [resolvable:$true] %s143_s12 }
  0x29   :  { %v213_v10 = vpack.c.bf16 %v47_v9, %v46_v8  ;;  %v49_v12 = vld [vmem:[#allocation5 + $0x38] sm:$0xff]  ;;  %v50_v14 = vld [vmem:[#allocation5 + $0x40] sm:$0xff]  ;;  %v51_v15 = vld [vmem:[#allocation5 + $0x48] sm:$0xff]  ;;  %s284_s13 = scalar_lea.vmem %s144_s12, 128  ;;  %p289_p3 = scmp.lt.s32.totalorder %s144_s12, %s144_s12 }
  0x2a   :  { %208 = vmatpush3.bf16.msra.mxu0 %v207_v5  ;;  %v216_v13 = vpack.c.bf16 %v49_v12, %v48_v11  ;;  %v219_v16 = vpack.c.bf16 %v51_v15, %v50_v14  ;;  %v52_v17 = vld [vmem:[#allocation5 + $0x50] sm:$0xff]  ;;  %v53_v18 = vld [vmem:[#allocation5 + $0x58] sm:$0xff]  ;;  %v54_v20 = vld [vmem:[#allocation5 + $0x60] sm:$0xff]  ;;  %p285_p2 = scmp.ne.s32.totalorder %s144_s12, %s284_s13  ;;  %p290_p4 = scmp.lt.s32.totalorder %s284_s13, %s284_s13 }
  0x2b   :  { %209 = vmatprep.subr.bf16.mxu0 %v316_v0  ;;  %v222_v19 = vpack.c.bf16 %v53_v18, %v52_v17  ;;  %v55_v21 = vld [vmem:[#allocation5 + $0x68] sm:$0xff]  ;;  %v56_v23 = vld [vmem:[#allocation5 + $0x70] sm:$0xff]  ;;  %v57_v24 = vld [vmem:[#allocation5 + $0x78] sm:$0xff] }
  0x2c   :  { %v225_v22 = vpack.c.bf16 %v55_v21, %v54_v20  ;;  %v228_v25 = vpack.c.bf16 %v57_v24, %v56_v23  ;;  %v41_v26 = vld [vmem:[#allocation2] sm:$0xff]  ;;  %p291_p5 = por %p290_p4, %p289_p3 }
  0x2d   :  { %v153_v27 = vld [vmem:[%s388_s2] ss:$0 sm:$0xff] }
  0x2e   :  { %211 = vmatpush3.bf16.msra.mxu0 %v210_v7  ;;  %p292_p6 = pnand %p291_p5, %p285_p2 }
  0x2f   :  { %212 = vmatprep.subr.bf16.mxu0 %v316_v0 }
  0x32   :  { %214 = vmatpush3.bf16.msra.mxu0 %v213_v10 }
  0x33   :  { %215 = vmatprep.subr.bf16.mxu0 %v316_v0 }
  0x36   :  { %217 = vmatpush3.bf16.msra.mxu0 %v216_v13 }
  0x37   :  { %218 = vmatprep.subr.bf16.mxu0 %v316_v0 }
  0x3a   :  { %220 = vmatpush3.bf16.msra.mxu0 %v219_v16 }
  0x3b   :  { %221 = vmatprep.subr.bf16.mxu0 %v316_v0 }
  0x3e   :  { %223 = vmatpush3.bf16.msra.mxu0 %v222_v19 }
  0x3f   :  { %224 = vmatprep.subr.bf16.mxu0 %v316_v0 }
  0x42   :  { %226 = vmatpush3.bf16.msra.mxu0 %v225_v22 }
  0x43   :  { %227 = vmatprep.subr.bf16.mxu0 %v316_v0 }
  0x46   :  { %229 = vmatpush3.bf16.msra.mxu0 %v228_v25 }
  0x49   :  { %204 = vmatmul.mubr.f32.vlgmr.msra.gmra.mrb[0].mxu0 %v41_v26 }
 0x11c   :  { %v131_v28 = vpop.f32.mrb[0].mxu0 }
 0x11d   :  { %v132_v29 = vadd.f32 %v153_v27, %v131_v28  ;;  %v205_v30 = vpop.f32.mrb[1].mxu0 }
 0x11f   :  { %238 = vtanh.f32 %v132_v29 }
 0x129   :  { %v239_v31 = vpop.eup %238 }
 0x12a   :  { %136 = vst [vmem:[#allocation7] sm:$0xff] %v239_v31 }
 0x12b   :  { %295 = shalt.err (!%p292_p6)
}
 0x12c   :  { %s296_s2 = scalar_lea.hbm %s389_s3, 128 }
 0x12d   :  { %p297_p7 = scmp.ne.s32.totalorder %s389_s3, %s296_s2  ;;  %p300_p8 = scmp.lt.u32.totalorder %s296_s2, %s389_s3 }
 0x12f   :  { %p302_p9 = pnand %p300_p8, %p297_p7 }
 0x131   :  { %305 = shalt.err (!%p302_p9)
}
 0x132   :  { %146 = dma.vmem_to_hbm [thread:$0]  %s144_s12, 128, %s389_s3, [#allocation4]  }
 0x133   :  { %310 = dma.done.wait [#allocation4], 128  }
 0x134   :  { %311 = vsyncadd [#allocation4], 4294967168 }
 0x135   :  { %150 = vsyncpa [#allocation3], 1 }
 0x136   :  { %151 = vsyncpa [#allocation6], 1 }
 0x137   :  { %152 = vsyncpa [#allocation4], 1 }

</bundles_post_ra>
